<compile_context>
chip_gen: v6e
topology: v6e:2x2x1
jax: 0.10.0
libtpu: 0.0.40
codegen_flags: <defaults>
</compile_context>

<pallas_src>
import jax
import jax.numpy as jnp
from jax.experimental import pallas as pl
from jax.experimental.pallas import tpu as pltpu

INPUT_SIZE = 784
HIDDEN = 50
NUM_CLASSES = 10

_TB_MAX = 2048  # max batch tile (multiple of 8); ~6.4 MiB bf16 x-tile (x2 buffers)


def _round_up(v, m):
    return ((v + m - 1) // m) * m


def _mlp_kernel(x_ref, w1_ref, b1_ref, w2_ref, b2_ref, o_ref):
    # Two MXU matmuls (bf16 inputs, f32 accumulation) + bias add + ReLU,
    # all on VMEM-resident tiles.
    x = x_ref[...]                                                    # (TB, 784) bf16
    h = jnp.dot(x, w1_ref[...], preferred_element_type=jnp.float32)  # (TB, 50) f32
    h = jnp.maximum(h + b1_ref[...], 0.0)                            # ReLU (f32)
    y = jnp.dot(h.astype(w2_ref.dtype), w2_ref[...],
                preferred_element_type=jnp.float32)                  # (TB, 10) f32
    o_ref[...] = (y + b2_ref[...]).astype(o_ref.dtype)


def nn_forward(x, w1, b1, w2, b2):
    B, K = x.shape
    H = w1.shape[1]
    N = w2.shape[1]

    # bf16 matmul inputs (halves HBM traffic on the dominant x read and uses
    # the native bf16 MXU path).  Biases / accumulator / output stay f32.
    x_bf = x.astype(jnp.bfloat16)
    w1_bf = w1.astype(jnp.bfloat16)
    w2_bf = w2.astype(jnp.bfloat16)
    b1_f = b1.astype(jnp.float32)
    b2_f = b2.astype(jnp.float32)

    # Batch tile: aim for at least 2 grid steps (so the "parallel" axis can
    # shard across both TensorCores on v7x), never larger than the (sublane-
    # rounded) batch, and capped at _TB_MAX for pipelining granularity.
    TB = min(_TB_MAX, max(8, _round_up(pl.cdiv(B, 2), 8)))
    TB = min(TB, _round_up(B, 8))
    grid = (pl.cdiv(B, TB),)

    # VMEM working set: double-buffered x & out tiles + resident weights +
    # hidden-activation headroom.  Comfortably below v7x's 64 MiB.
    vmem_bytes = (
        2 * TB * K * 2              # x tile (bf16), double buffered
        + 2 * TB * 128 * 4          # out tile (f32, lane-padded), double buffered
        + 2 * TB * 64 * 4           # hidden activation headroom (f32 + bf16 copy)
        + (K * 64 + 64 * 128) * 2   # weights (bf16, tile-padded)
        + 4 * (64 + 128)            # biases
    ) + (2 << 20)
    vmem_limit = int(min(max(vmem_bytes, 16 << 20), 64 << 20))

    flops = 2 * B * (K * H + H * N)
    bytes_accessed = (
        2 * (B * K + K * H + H * N)     # bf16 inputs / weights
        + 4 * (H + N + B * N)           # f32 biases + output
    )

    out = pl.pallas_call(
        _mlp_kernel,
        out_shape=jax.ShapeDtypeStruct((B, N), jnp.float32),
        grid=grid,
        in_specs=[
            pl.BlockSpec((TB, K), lambda i: (i, 0)),   # x: batch-tiled
            pl.BlockSpec((K, H), lambda i: (0, 0)),    # w1: VMEM-resident
            pl.BlockSpec((1, H), lambda i: (0, 0)),    # b1
            pl.BlockSpec((H, N), lambda i: (0, 0)),    # w2
            pl.BlockSpec((1, N), lambda i: (0, 0)),    # b2
        ],
        out_specs=pl.BlockSpec((TB, N), lambda i: (i, 0)),
        compiler_params=pltpu.CompilerParams(
            dimension_semantics=("parallel",),
            vmem_limit_bytes=vmem_limit,
        ),
        cost_estimate=pl.CostEstimate(
            flops=flops, transcendentals=0, bytes_accessed=bytes_accessed
        ),
    )(x_bf, w1_bf, b1_f, w2_bf, b2_f)

    return out


def init_params(key):
    # Deterministic init mimicking nn.Linear's uniform(-1/sqrt(fan_in), ...).
    k1, k2, k3, k4 = jax.random.split(key, 4)
    bound1 = 1.0 / jnp.sqrt(jnp.float32(INPUT_SIZE))
    bound2 = 1.0 / jnp.sqrt(jnp.float32(HIDDEN))
    w1 = jax.random.uniform(k1, (INPUT_SIZE, HIDDEN), jnp.float32, -bound1, bound1)
    b1 = jax.random.uniform(k2, (1, HIDDEN), jnp.float32, -bound1, bound1)
    w2 = jax.random.uniform(k3, (HIDDEN, NUM_CLASSES), jnp.float32, -bound2, bound2)
    b2 = jax.random.uniform(k4, (1, NUM_CLASSES), jnp.float32, -bound2, bound2)
    return w1, b1, w2, b2


if __name__ == "__main__":
    key = jax.random.PRNGKey(0)
    kx, kp = jax.random.split(key)

    batch = 8
    x = jax.random.normal(kx, (batch, INPUT_SIZE), jnp.float32)
    w1, b1, w2, b2 = init_params(kp)

    out = nn_forward(x, w1, b1, w2, b2)
    jax.block_until_ready(out)

    # Correctness check against a pure-f32 JAX reference.  bf16 matmul inputs
    # (with f32 accumulation) give ~1e-3 relative deviation, so the tolerance
    # is loosened accordingly.
    ref = jnp.maximum(x @ w1 + b1, 0.0) @ w2 + b2
    assert out.shape == (batch, NUM_CLASSES)
    assert jnp.allclose(out, ref, atol=2e-2, rtol=2e-2)

    print("KERNEL_OK")
</pallas_src>

<mosaic_0001>
module attributes {stable_mosaic.version = 11 : i64} {
  func.func @_mlp_kernel(%arg0: i32, %arg1: memref<8x784xbf16, #tpu.memory_space<vmem>>, %arg2: memref<784x50xbf16, #tpu.memory_space<vmem>>, %arg3: memref<1x50xf32, #tpu.memory_space<vmem>>, %arg4: memref<50x10xbf16, #tpu.memory_space<vmem>>, %arg5: memref<1x10xf32, #tpu.memory_space<vmem>>, %arg6: memref<8x10xf32, #tpu.memory_space<vmem>>) attributes {dimension_semantics = [#tpu.dimension_semantics<parallel>], iteration_bounds = array<i64: 1>, scalar_prefetch = 0 : i64, scratch_operands = 0 : i64, tpu.core_type = #tpu.core_type<tc>, window_params = [{transform_indices = @transform_0, window_bounds = array<i64: 8, 784>}, {pipeline_mode = #tpu.pipeline_mode<synchronous>, transform_indices = @transform_1, window_bounds = array<i64: 784, 50>}, {pipeline_mode = #tpu.pipeline_mode<synchronous>, transform_indices = @transform_2, window_bounds = array<i64: 1, 50>}, {pipeline_mode = #tpu.pipeline_mode<synchronous>, transform_indices = @transform_3, window_bounds = array<i64: 50, 10>}, {pipeline_mode = #tpu.pipeline_mode<synchronous>, transform_indices = @transform_4, window_bounds = array<i64: 1, 10>}, {transform_indices = @transform_5, window_bounds = array<i64: 8, 10>}]} {
    %c0 = arith.constant 0 : index
    %c0_0 = arith.constant 0 : index
    %0 = vector.load %arg1[%c0, %c0_0] : memref<8x784xbf16, #tpu.memory_space<vmem>>, vector<8x784xbf16>
    %c0_1 = arith.constant 0 : index
    %c0_2 = arith.constant 0 : index
    %1 = vector.load %arg2[%c0_1, %c0_2] : memref<784x50xbf16, #tpu.memory_space<vmem>>, vector<784x50xbf16>
    %cst = arith.constant dense<0.000000e+00> : vector<8x50xf32>
    %2 = tpu.matmul %0, %1, %cst {dimension_numbers = #tpu.dot_dimension_numbers<[1], [0], [0], [1], [0, 0, 1, 1], [], []>} : vector<8x784xbf16>, vector<784x50xbf16>, vector<8x50xf32> -> vector<8x50xf32>
    %c0_3 = arith.constant 0 : index
    %c0_4 = arith.constant 0 : index
    %3 = vector.load %arg3[%c0_3, %c0_4] : memref<1x50xf32, #tpu.memory_space<vmem>>, vector<1x50xf32>
    %4 = vector.broadcast %3 : vector<1x50xf32> to vector<8x50xf32>
    %5 = arith.addf %2, %4 : vector<8x50xf32>
    %cst_5 = arith.constant 0.000000e+00 : f32
    %6 = vector.broadcast %cst_5 : f32 to vector<8x50xf32>
    %7 = arith.maximumf %5, %6 : vector<8x50xf32>
    %8 = arith.truncf %7 : vector<8x50xf32> to vector<8x50xbf16>
    %c0_6 = arith.constant 0 : index
    %c0_7 = arith.constant 0 : index
    %9 = vector.load %arg4[%c0_6, %c0_7] : memref<50x10xbf16, #tpu.memory_space<vmem>>, vector<50x10xbf16>
    %cst_8 = arith.constant dense<0.000000e+00> : vector<8x10xf32>
    %10 = tpu.matmul %8, %9, %cst_8 {dimension_numbers = #tpu.dot_dimension_numbers<[1], [0], [0], [1], [0, 0, 1, 1], [], []>} : vector<8x50xbf16>, vector<50x10xbf16>, vector<8x10xf32> -> vector<8x10xf32>
    %c0_9 = arith.constant 0 : index
    %c0_10 = arith.constant 0 : index
    %11 = vector.load %arg5[%c0_9, %c0_10] : memref<1x10xf32, #tpu.memory_space<vmem>>, vector<1x10xf32>
    %12 = vector.broadcast %11 : vector<1x10xf32> to vector<8x10xf32>
    %13 = arith.addf %10, %12 : vector<8x10xf32>
    %c0_11 = arith.constant 0 : index
    %c0_12 = arith.constant 0 : index
    %14 = vector.load %arg6[%c0_11, %c0_12] : memref<8x10xf32, #tpu.memory_space<vmem>>, vector<8x10xf32>
    tpu.vector_store %arg6[%c0_11, %c0_12], %13 {strides = array<i32>} : memref<8x10xf32, #tpu.memory_space<vmem>>, vector<8x10xf32>,
    return
  }
  func.func @transform_0(%arg0: i32) -> (i32, i32) {
    %c0_i32 = arith.constant 0 : i32
    %c0_i32_0 = arith.constant 0 : i32
    return %arg0, %c0_i32 : i32, i32
  }
  func.func @transform_1(%arg0: i32) -> (i32, i32) {
    %c0_i32 = arith.constant 0 : i32
    %c0_i32_0 = arith.constant 0 : i32
    %c0_i32_1 = arith.constant 0 : i32
    return %c0_i32, %c0_i32_0 : i32, i32
  }
  func.func @transform_2(%arg0: i32) -> (i32, i32) {
    %c0_i32 = arith.constant 0 : i32
    %c0_i32_0 = arith.constant 0 : i32
    %c0_i32_1 = arith.constant 0 : i32
    return %c0_i32, %c0_i32_0 : i32, i32
  }
  func.func @transform_3(%arg0: i32) -> (i32, i32) {
    %c0_i32 = arith.constant 0 : i32
    %c0_i32_0 = arith.constant 0 : i32
    %c0_i32_1 = arith.constant 0 : i32
    return %c0_i32, %c0_i32_0 : i32, i32
  }
  func.func @transform_4(%arg0: i32) -> (i32, i32) {
    %c0_i32 = arith.constant 0 : i32
    %c0_i32_0 = arith.constant 0 : i32
    %c0_i32_1 = arith.constant 0 : i32
    return %c0_i32, %c0_i32_0 : i32, i32
  }
  func.func @transform_5(%arg0: i32) -> (i32, i32) {
    %c0_i32 = arith.constant 0 : i32
    %c0_i32_0 = arith.constant 0 : i32
    return %arg0, %c0_i32 : i32, i32
  }
}

</mosaic_0001>

<bundles_post_ra>
// kernel: tpu_custom_call.1
= control target key start
LH: loop header
LB: loop body
LE: loop exit
PB: predicated region body
PF: predicated region fallthrough
CT: control target
= control target key end

     0   :  { %v954_v43 = vmov 0.0   ;;  %vm955_vm0 = vmmov 0   ;;  %vm449_vm1 = vcmask 130048   ;;  %s1169_s0 = inlined_call_operand.vmem [shape: bf16[8,784], index: 0, kind: input, shape index: {}]   ;;  %s1170_s1 = inlined_call_operand.vmem [shape: bf16[784,50], index: 1, kind: input, shape index: {}]   ;;  %s1171_s2 = inlined_call_operand.vmem [shape: f32[1,50], index: 2, kind: input, shape index: {}]   ;;  %s1172_s3 = inlined_call_operand.vmem [shape: bf16[50,10], index: 3, kind: input, shape index: {}]   ;;  %s1173_s4 = inlined_call_operand.vmem [shape: f32[1,10], index: 4, kind: input, shape index: {}]   ;;  %s1174_s5 = inlined_call_operand.hbm [shape: f32[8,10], index: 5, kind: output, shape index: {}]  }
   0x1   :  { %v872_v0 = vld [vmem:[%s1170_s1 + $0x78] sm:$0xff]   ;;  %v876_v4 = vld [vmem:[%s1170_s1 + $0x70] sm:$0xff]   ;;  %v880_v8 = vld [vmem:[%s1170_s1 + $0x68] sm:$0xff]  }
   0x2   :  { %v873_v1 = vld [vmem:[%s1170_s1 + $0x38] sm:$0xff]   ;;  %778 = vmatprep.subr.bf16.mxu0 %v872_v0  ;;  %v877_v5 = vld [vmem:[%s1170_s1 + $0x30] sm:$0xff]   ;;  %v881_v9 = vld [vmem:[%s1170_s1 + $0x28] sm:$0xff]  }
   0x3   :  { %v874_v2 = vld [vmem:[%s1170_s1 + $0xf8] sm:$0xff]   ;;  %779 = vmatpush3.bf16.msra.mxu0 %v873_v1  ;;  %v878_v6 = vld [vmem:[%s1170_s1 + $0xf0] sm:$0xff]   ;;  %v882_v10 = vld [vmem:[%s1170_s1 + $0xe8] sm:$0xff]  }
   0x4   :  { %v875_v3 = vld [vmem:[%s1170_s1 + $0xb8] sm:$0xff]   ;;  %800 = vmatprep.subr.bf16.mxu1 %v874_v2  ;;  %780 = vmatprep.subr.bf16.mxu0 %v876_v4  ;;  %v879_v7 = vld [vmem:[%s1170_s1 + $0xb0] sm:$0xff]   ;;  %v883_v11 = vld [vmem:[%s1170_s1 + $0xa8] sm:$0xff]  }
   0x5   :  { %801 = vmatpush3.bf16.msra.mxu1 %v875_v3  ;;  %v884_v12 = vld [vmem:[%s1170_s1 + $0x60] sm:$0xff]   ;;  %v888_v16 = vld [vmem:[%s1170_s1 + $0x58] sm:$0xff]   ;;  %v892_v20 = vld [vmem:[%s1170_s1 + $0x50] sm:$0xff]  }
   0x6   :  { %802 = vmatprep.subr.bf16.mxu1 %v878_v6  ;;  %v885_v13 = vld [vmem:[%s1170_s1 + $0x20] sm:$0xff]   ;;  %v889_v17 = vld [vmem:[%s1170_s1 + $0x18] sm:$0xff]   ;;  %v893_v21 = vld [vmem:[%s1170_s1 + $0x10] sm:$0xff]  }
   0x7   :  { %781 = vmatpush3.bf16.msra.mxu0 %v877_v5  ;;  %v886_v14 = vld [vmem:[%s1170_s1 + $0xe0] sm:$0xff]   ;;  %v890_v18 = vld [vmem:[%s1170_s1 + $0xd8] sm:$0xff]   ;;  %v894_v22 = vld [vmem:[%s1170_s1 + $0xd0] sm:$0xff]  }
   0x8   :  { %782 = vmatprep.subr.bf16.mxu0 %v880_v8  ;;  %v887_v15 = vld [vmem:[%s1170_s1 + $0xa0] sm:$0xff]   ;;  %v891_v19 = vld [vmem:[%s1170_s1 + $0x98] sm:$0xff]   ;;  %v895_v23 = vld [vmem:[%s1170_s1 + $0x90] sm:$0xff]  }
   0x9   :  { %803 = vmatpush3.bf16.msra.mxu1 %v879_v7  ;;  %v896_v24 = vld [vmem:[%s1170_s1 + $0x48] sm:$0xff]   ;;  %v900_v28 = vld [vmem:[%s1170_s1 + $0x40] sm:$0xff]   ;;  %v906_v35 = vld [vmem:[%s1170_s1 + $0x178] sm:$0xff]  }
   0xa   :  { %804 = vmatprep.subr.bf16.mxu1 %v882_v10  ;;  %v897_v25 = vld [vmem:[%s1170_s1 + $0x8] sm:$0xff]   ;;  %v901_v29 = vld [vmem:[%s1170_s1] sm:$0xff]   ;;  %v909_v39 = vld [vmem:[%s1170_s1 + $0x138] sm:$0xff]  }
   0xb   :  { %783 = vmatpush3.bf16.msra.mxu0 %v881_v9  ;;  %v898_v26 = vld [vmem:[%s1170_s1 + $0xc8] sm:$0xff]   ;;  %v902_v30 = vld [vmem:[%s1170_s1 + $0xc0] sm:$0xff]   ;;  %v910_v40 = vld [vmem:[%s1170_s1 + $0x170] sm:$0xff]  }
   0xc   :  { %784 = vmatprep.subr.bf16.mxu0 %v884_v12  ;;  %v899_v27 = vld [vmem:[%s1170_s1 + $0x88] sm:$0xff]   ;;  %v22_v31 = vld [vmem:[%s1169_s0] sm:$0xff]  ;;  %v911_v41 = vld [vmem:[%s1170_s1 + $0x130] sm:$0xff]  }
   0xd   :  { %805 = vmatpush3.bf16.msra.mxu1 %v883_v11  ;;  %v715_v32 = vcombine.low %v22_v31, %v22_v31  ;;  %v716_v33 = vcombine.high %v22_v31, %v22_v31  ;;  %v905_v34 = vld [vmem:[%s1170_s1 + $0x80] sm:$0xff]   ;;  %v23_v36 = vld [vmem:[%s1169_s0 + $0x8] sm:$0xff]  ;;  %v916_v47 = vld [vmem:[%s1170_s1 + $0x158] sm:$0xff]  }
   0xe   :  { %806 = vmatprep.subr.bf16.mxu1 %v886_v14  ;;  %v717_v37 = vcombine.low %v23_v36, %v23_v36  ;;  %v718_v38 = vcombine.high %v23_v36, %v23_v36  ;;  %v912_v42 = vld [vmem:[%s1170_s1 + $0x168] sm:$0xff]   ;;  %v914_v45 = vld [vmem:[%s1170_s1 + $0x160] sm:$0xff]   ;;  %v917_v48 = vld [vmem:[%s1170_s1 + $0x118] sm:$0xff]  }
   0xf   :  { %785 = vmatpush3.bf16.msra.mxu0 %v885_v13  ;;  %485 = vmatprep.mubr.bf16.mxu0 %v716_v33  ;;  %v913_v44 = vld [vmem:[%s1170_s1 + $0x128] sm:$0xff]   ;;  %v915_v46 = vld [vmem:[%s1170_s1 + $0x120] sm:$0xff]   ;;  %v918_v49 = vld [vmem:[%s1170_s1 + $0x150] sm:$0xff]  }
  0x10   :  { %786 = vmatprep.subr.bf16.mxu0 %v888_v16  ;;  %525 = vmatprep.mubr.bf16.mxu1 %v718_v38  ;;  %v924_v50 = vld [vmem:[%s1170_s1 + $0x180] sm:$0xff]   ;;  %v24_v51 = vld [vmem:[%s1169_s0 + $0x10] sm:$0xff]  ;;  %v927_v54 = vld [vmem:[%s1169_s0 + $0x18] ss:$0 sps:$4 sm:$0xff]  }
  0x11   :  { %807 = vmatpush3.bf16.msra.mxu1 %v887_v15  ;;  %v919_v52 = vld [vmem:[%s1170_s1 + $0x110] sm:$0xff]   ;;  %v720_v53 = vcombine.high %v24_v51, %v24_v51  ;;  %v920_v55 = vld [vmem:[%s1170_s1 + $0x148] sm:$0xff]  }
  0x12   :  { %808 = vmatprep.subr.bf16.mxu1 %v890_v18 }
  0x13   :  { %787 = vmatpush3.bf16.msra.mxu0 %v889_v17 }
  0x14   :  { %788 = vmatprep.subr.bf16.mxu0 %v892_v20 }
  0x15   :  { %809 = vmatpush3.bf16.msra.mxu1 %v891_v19 }
  0x16   :  { %810 = vmatprep.subr.bf16.mxu1 %v894_v22 }
  0x17   :  { %789 = vmatpush3.bf16.msra.mxu0 %v893_v21 }
  0x18   :  { %790 = vmatprep.subr.bf16.mxu0 %v896_v24 }
  0x19   :  { %811 = vmatpush3.bf16.msra.mxu1 %v895_v23 }
  0x1a   :  { %812 = vmatprep.subr.bf16.mxu1 %v898_v26 }
  0x1b   :  { %791 = vmatpush3.bf16.msra.mxu0 %v897_v25 }
  0x1c   :  { %792 = vmatprep.subr.bf16.mxu0 %v900_v28 }
  0x1d   :  { %813 = vmatpush3.bf16.msra.mxu1 %v899_v27 }
  0x1e   :  { %814 = vmatprep.subr.bf16.mxu1 %v902_v30 }
  0x1f   :  { %793 = vmatpush3.bf16.msra.mxu0 %v901_v29 }
  0x20   :  { %822 = vmatprep.subr.bf16.mxu0 %v906_v35 }
  0x21   :  { %815 = vmatpush3.bf16.msra.mxu1 %v905_v34 }
  0x22   :  { %486 = vmatmul.mubr.bf16.vlgmr.msra.gmra.mxu0 %v715_v32  ;;  %851 = vmatprep.subr.bf16.mxu1 %v954_v43 }
  0x23   :  { %823 = vmatpush3.bf16.msra.mxu0 %v909_v39  ;;  %565 = vmatprep.mubr.bf16.mxu0 %v720_v53 }
  0x24   :  { %526 = vmatmul.mubr.bf16.vlgmr.msra.gmra.mxu1 %v717_v37  ;;  %824 = vmatprep.subr.bf16.mxu0 %v910_v40 }
  0x25   :  { %853 = vmatprep.mubr.msk.bf16.mxu1 %vm955_vm0, %v954_v43  ;;  %852 = vmatpush3.bf16.msra.mxu1 %v924_v50 }
  0x26   :  { %857 = vmatprep.subr.bf16.mxu1 %v954_v43 }
  0x27   :  { %825 = vmatpush3.bf16.msra.mxu0 %v911_v41 }
  0x28   :  { %826 = vmatprep.subr.bf16.mxu0 %v912_v42 }
  0x2b   :  { %827 = vmatpush3.bf16.msra.mxu0 %v913_v44 }
  0x2c   :  { %828 = vmatprep.subr.bf16.mxu0 %v914_v45 }
  0x2f   :  { %829 = vmatpush3.bf16.msra.mxu0 %v915_v46 }
  0x30   :  { %830 = vmatprep.subr.bf16.mxu0 %v916_v47 }
  0x33   :  { %831 = vmatpush3.bf16.msra.mxu0 %v917_v48 }
  0x34   :  { %832 = vmatprep.subr.bf16.mxu0 %v918_v49 }
  0x35   :  { %10 = vsyncpa [#allocation3], 0  ;;  %854 = vmatmul.mubr.msk.bf16.vlgmr.msra.gmra.mxu1 %vm449_vm1, %v927_v54  ;;  %v921_v56 = vld [vmem:[%s1170_s1 + $0x108] sm:$0xff]   ;;  %v922_v57 = vld [vmem:[%s1170_s1 + $0x140] sm:$0xff]   ;;  %v719_v59 = vcombine.low %v24_v51, %v24_v51  ;;  %vm654_vm2 = vcmask 1040384   ;;  %vm650_vm3 = vcmask 408576  }
  0x36   :  { %865 = vmatprep.mubr.msk.bf16.mxu1 %vm955_vm0, %v954_v43  ;;  %v923_v58 = vld [vmem:[%s1170_s1 + $0x100] sm:$0xff]   ;;  %v928_v60 = vld [vmem:[%s1172_s3 + $0x18] ss:$0 sps:$4 sm:$0x11]   ;;  %v929_v62 = vld [vmem:[%s1172_s3 + $0x10] sm:$0xff]   ;;  %s956_s8 = smov [#allocation2]  }
  0x37   :  { %833 = vmatpush3.bf16.msra.mxu0 %v919_v52  ;;  %v656_v61 = vsel %vm654_vm2, %v928_v60, 0  ;;  %v930_v63 = vld [vmem:[%s1172_s3 + $0x8] sm:$0xff]   ;;  %v931_v0 = vld [vmem:[%s1172_s3] sm:$0xff]   ;;  %vm698_vm4 = vcmask 80896  }
  0x38   :  { %834 = vmatprep.subr.bf16.mxu0 %v920_v55  ;;  %858 = vmatpush3.bf16.msra.mxu1 %v656_v61  ;;  %v714_v14 = vld [vmem:[%s1171_s2] ss:$0 sm:$0xff]  ;;  %s706_s2 = sshll.u32 %s956_s8, 4  ;;  %s707_s2 = int_to_ptr.vmem [resolvable:$true] %s706_s2 }
  0x39   :  { %859 = vmatprep.subr.bf16.mxu1 %v954_v43  ;;  %v772_v27 = vld [vmem:[%s1173_s4] ss:$0 sm:$0xff]  ;;  %s932_s9 = scalar_lea.vmem %s707_s2, 128  ;;  %p937_p1 = scmp.lt.s32.totalorder %s707_s2, %s707_s2 }
  0x3a   :  { %p933_p0 = scmp.ne.s32.totalorder %s707_s2, %s932_s9  ;;  %p938_p2 = scmp.lt.s32.totalorder %s932_s9, %s932_s9 }
  0x3b   :  { %835 = vmatpush3.bf16.msra.mxu0 %v921_v56 }
  0x3c   :  { %836 = vmatprep.subr.bf16.mxu0 %v922_v57  ;;  %860 = vmatpush3.bf16.msra.mxu1 %v929_v62  ;;  %p939_p3 = por %p938_p2, %p937_p1 }
  0x3d   :  { %861 = vmatprep.subr.bf16.mxu1 %v954_v43 }
  0x3e   :  { %p940_p4 = pnand %p939_p3, %p933_p0 }
  0x3f   :  { %837 = vmatpush3.bf16.msra.mxu0 %v923_v58 }
  0x40   :  { %862 = vmatpush3.bf16.msra.mxu1 %v930_v63 }
  0x41   :  { %863 = vmatprep.subr.bf16.mxu1 %v954_v43 }
  0x42   :  { %566 = vmatmul.mubr.bf16.vlgmr.msra.gmra.mxu0 %v719_v59 }
  0x44   :  { %864 = vmatpush3.bf16.msra.mxu1 %v931_v0 }
  0xe2   :  { %v794_v1 = vpop.f32.mrf.mxu0 }
  0xe4   :  { %v795_v2 = vpop.f32.mrf.mxu0  ;;  %v816_v3 = vpop.f32.mrf.mxu1 }
  0xe5   :  { %v796_v13 = vadd.f32 %v795_v2, %v794_v1 }
  0xe6   :  { %v797_v4 = vpop.f32.mrf.mxu0  ;;  %v817_v5 = vpop.f32.mrf.mxu1 }
  0xe7   :  { %v488_v15 = vadd.f32 %v796_v13, %v714_v14  ;;  %v818_v16 = vadd.f32 %v817_v5, %v816_v3 }
  0xe8   :  { %v798_v6 = vpop.f32.mrf.mxu0  ;;  %v819_v7 = vpop.f32.mrf.mxu1 }
  0xe9   :  { %v528_v19 = vadd.f32 %v818_v16, %v488_v15 }
  0xea   :  { %v820_v8 = vpop.f32.mrf.mxu1 }
  0xf5   :  { %v607_v9 = vpop.f32.mrf.mxu1 }
  0xf7   :  { %v855_v10 = vpop.f32.mrf.mxu1 }
  0xf9   :  { %v610_v11 = vpop.f32.mrf.mxu1 }
  0xfb   :  { %v856_v12 = vpop.f32.mrf.mxu1 }
 0x102   :  { %v838_v17 = vpop.f32.mrf.mxu0 }
 0x104   :  { %v839_v18 = vpop.f32.mrf.mxu0 }
 0x105   :  { %v840_v20 = vadd.f32 %v839_v18, %v838_v17 }
 0x106   :  { %v841_v21 = vpop.f32.mrf.mxu0 }
 0x107   :  { %v568_v22 = vadd.f32 %v840_v20, %v528_v19 }
 0x108   :  { %v842_v23 = vpop.f32.mrf.mxu0 }
 0x109   :  { %v608_v24 = vadd.f32 %v607_v9, %v568_v22 }
 0x10b   :  { %v613_v25 = vmax.f32 %v608_v24, 0.0 }
 0x10d   :  { %v614_v26 = vpack.c.bf16 %v613_v25, %v613_v25 }
 0x10f   :  { %866 = vmatmul.mubr.msk.bf16.vlgmr.msra.gmra.mxu1 %vm650_vm3, %v614_v26 }
 0x1cf   :  { %v692_v28 = vpop.f32.mrf.mxu1 }
 0x1d0   :  { %v693_v29 = vadd.f32 %v772_v27, %v692_v28 }
 0x1d1   :  { %v867_v30 = vpop.f32.mrf.mxu1 }
 0x1d2   :  { %699 = vst.msk [vmem:[#allocation2] sm:$0xff] %vm698_vm4, %v693_v29 }
 0x1d3   :  { %v695_v31 = vpop.f32.mrf.mxu1 }
 0x1d4   :  { %943 = shalt.err (!%p940_p4)
}
 0x1d5   :  { %709 = dma.vmem_to_hbm [thread:$0]  %s707_s2, 128, %s1174_s5, [#allocation3]   ;;  %v868_v32 = vpop.f32.mrf.mxu1 }
 0x1d6   :  { %952 = dma.done.wait [#allocation3], 128  }
 0x1d7   :  { %953 = vsyncadd [#allocation3], 4294967168 }
 0x1d8   :  { %713 = vsyncpa [#allocation3], 1 }

</bundles_post_ra>
